<compile_context>
chip_gen: v6e
topology: v6e:2x2x1
jax: 0.10.0
libtpu: 0.0.40
codegen_flags: <defaults>
</compile_context>

<pallas_src>
import math

import jax
import jax.numpy as jnp
from jax.experimental import pallas as pl
from jax.experimental.pallas import tpu as pltpu

LANE = 128     # lane width / batch-tile and hidden-dim alignment
SUBLANE = 8    # sublane width / padded output rows (3 -> 8)


def _round_up(n, m):
    return -(-n // m) * m


def _adv_kernel(x_ref, w1_ref, b1_ref, w2_ref, b2_ref, w3t_ref, b3t_ref, yt_ref):
    # x arrives f32 from HBM; cast to bf16 on the VPU (free in this mem-bound
    # regime) so the MXU runs bf16 with f32 accumulation.
    x = x_ref[...].astype(jnp.bfloat16)                                   # (TM, F)

    # Layer 1: Linear + ReLU   (dropout1 == identity in eval mode)
    h1 = jnp.dot(x, w1_ref[...], preferred_element_type=jnp.float32) + b1_ref[...]
    h1 = jnp.maximum(h1, 0.0).astype(jnp.bfloat16)                        # (TM, Hp)

    # Layer 2: Linear + ReLU   (dropout2 == identity in eval mode)
    h2 = jnp.dot(h1, w2_ref[...], preferred_element_type=jnp.float32) + b2_ref[...]
    h2 = jnp.maximum(h2, 0.0).astype(jnp.bfloat16)                        # (TM, Hp)

    # Layer 3, transposed: (OP, Hp) contracted with (TM, Hp) over Hp -> (OP, TM).
    # Output lanes = TM (dense, unmasked stores); sublanes = OP = 8.
    logits_t = jax.lax.dot_general(
        w3t_ref[...], h2,
        dimension_numbers=(((1,), (1,)), ((), ())),
        preferred_element_type=jnp.float32,
    ) + b3t_ref[...]                                                      # (OP, TM)

    # sigmoid = 1 / (1 + exp(-z)); exp + approximate reciprocal both on the EUP.
    yt_ref[...] = pl.reciprocal(1.0 + jnp.exp(-logits_t), approx=True).astype(yt_ref.dtype)
    # TODO(synk): training-mode dropout / gradient-reversal (grl_hook, coeff) only
    # affect training & backward; eval-mode forward semantics are complete.


def prepare_params(params):
    """One-time prep: bf16 casts, pad hidden dim to a multiple of 128, store W3 transposed."""
    F, H = params["w1"].shape
    O = params["w3"].shape[1]
    Hp = _round_up(H, LANE)
    OP = SUBLANE  # 3 output units padded to 8 sublanes

    w1 = jnp.zeros((F, Hp), jnp.bfloat16).at[:, :H].set(params["w1"].astype(jnp.bfloat16))
    b1 = jnp.zeros((1, Hp), jnp.float32).at[:, :H].set(params["b1"].astype(jnp.float32))
    w2 = jnp.zeros((Hp, Hp), jnp.bfloat16).at[:H, :H].set(params["w2"].astype(jnp.bfloat16))
    b2 = jnp.zeros((1, Hp), jnp.float32).at[:, :H].set(params["b2"].astype(jnp.float32))
    # Last layer stored transposed + padded: (OP, Hp); bias as a (OP, 1) column.
    w3t = jnp.zeros((OP, Hp), jnp.bfloat16).at[:O, :H].set(params["w3"].T.astype(jnp.bfloat16))
    b3t = jnp.zeros((OP, 1), jnp.float32).at[:O, :].set(params["b3"].T.astype(jnp.float32))

    return {"w1": w1, "b1": b1, "w2": w2, "b2": b2, "w3t": w3t, "b3t": b3t,
            "F": F, "H": H, "Hp": Hp, "O": O, "OP": OP}


def adversarial_network_consistency(x, prep, *, tm=2048):
    """Pallas forward. x: (B, F) float32. prep: output of prepare_params()."""
    B, F = x.shape
    assert F == prep["F"]
    Hp, OP, O = prep["Hp"], prep["OP"], prep["O"]

    # --- batch tile sizing -------------------------------------------------
    # Multiple of 128 (lane-dense transposed output stores).
    TM = _round_up(min(max(tm, LANE), max(B, LANE)), LANE)
    # Keep >=2 (roughly balanced) tiles when B allows, so both v7x TensorCores
    # get work under dimension_semantics=("parallel",).
    if B > LANE:
        TM = min(TM, _round_up(-(-B // 2), LANE))

    def vmem_estimate(tm_):
        x_bytes = 2 * tm_ * F * 4                 # f32 x block, double-buffered
        out_bytes = 2 * OP * tm_ * 4              # transposed y block, double-buffered
        w_bytes = 2 * (F * Hp * 2 + Hp * Hp * 2 + OP * Hp * 2 + 3 * 8 * Hp * 4)
        inter = 2 * tm_ * Hp * (4 + 2)            # h1/h2 f32 + bf16 slabs (headroom)
        return x_bytes + out_bytes + w_bytes + inter

    BUDGET = 24 * 1024 * 1024                     # safe on v5e/v6e/v7x
    while TM > LANE and vmem_estimate(TM) > BUDGET:
        TM -= LANE

    grid_m = pl.cdiv(B, TM)
    Bp = grid_m * TM
    xp = x if Bp == B else jnp.pad(x, ((0, Bp - B), (0, 0)))

    vmem_limit = int(min(max(2 * vmem_estimate(TM), 16 * 1024 * 1024), 48 * 1024 * 1024))

    const = lambda shape: pl.BlockSpec(shape, lambda i: (0, 0))  # VMEM-resident weights

    yt = pl.pallas_call(
        _adv_kernel,
        out_shape=jax.ShapeDtypeStruct((OP, Bp), jnp.float32),
        grid=(grid_m,),
        in_specs=[
            pl.BlockSpec((TM, F), lambda i: (i, 0)),   # x tiles stream through (f32)
            const((F, Hp)),                            # w1
            const((1, Hp)),                            # b1
            const((Hp, Hp)),                           # w2
            const((1, Hp)),                            # b2
            const((OP, Hp)),                           # w3^T (row-padded 3->8)
            const((OP, 1)),                            # b3^T
        ],
        out_specs=pl.BlockSpec((OP, TM), lambda i: (0, i)),   # lane-dense y^T slab
        compiler_params=pltpu.CompilerParams(
            dimension_semantics=("parallel",),
            vmem_limit_bytes=vmem_limit,
        ),
    )(xp, prep["w1"], prep["b1"], prep["w2"], prep["b2"], prep["w3t"], prep["b3t"])

    # Tiny slice + transpose back to (B, 3); padded rows/lanes are dropped here.
    return yt[:O, :B].T


def init_params(key, in_feature_co, hidden_size_co):
    """Deterministic Xavier-normal weights, zero biases (matches init_weights for Linear)."""
    k1, k2, k3 = jax.random.split(key, 3)

    def xavier_normal(k, fan_in, fan_out):
        std = math.sqrt(2.0 / (fan_in + fan_out))
        # stored as (in, out) == transpose of PyTorch's (out, in)
        return std * jax.random.normal(k, (fan_in, fan_out), dtype=jnp.float32)

    return {
        "w1": xavier_normal(k1, in_feature_co, hidden_size_co),
        "b1": jnp.zeros((1, hidden_size_co), jnp.float32),
        "w2": xavier_normal(k2, hidden_size_co, hidden_size_co),
        "b2": jnp.zeros((1, hidden_size_co), jnp.float32),
        "w3": xavier_normal(k3, hidden_size_co, 3),
        "b3": jnp.zeros((1, 3), jnp.float32),
    }


def reference_forward(x, p):
    h1 = jnp.maximum(x @ p["w1"] + p["b1"], 0.0)
    h2 = jnp.maximum(h1 @ p["w2"] + p["b2"], 0.0)
    return jax.nn.sigmoid(h2 @ p["w3"] + p["b3"])


if __name__ == "__main__":
    key = jax.random.PRNGKey(0)
    kx, kp = jax.random.split(key)

    # Small shapes consistent with the module; B=260 + tm=128 exercises the
    # multi-tile grid (3 tiles) and the ragged-batch padding path.
    B, in_feature_co, hidden_size_co = 260, 32, 32
    x = jax.random.normal(kx, (B, in_feature_co), dtype=jnp.float32)
    params = init_params(kp, in_feature_co, hidden_size_co)
    prep = prepare_params(params)   # one-time weight prep (hoisted out of the call path)

    fwd = jax.jit(lambda xx: adversarial_network_consistency(xx, prep, tm=128))
    y = jax.block_until_ready(fwd(x))

    y_ref = reference_forward(x, params)
    assert y.shape == (B, 3)
    # bf16 weights + approx reciprocal -> compare against f32 reference with loose tolerance.
    assert jnp.allclose(y, y_ref, atol=2e-2, rtol=2e-2), float(jnp.max(jnp.abs(y - y_ref)))

    print("KERNEL_OK")
</pallas_src>

<mosaic_0001>
module attributes {stable_mosaic.version = 11 : i64} {
  func.func @_adv_kernel(%arg0: i32, %arg1: memref<128x32xf32, #tpu.memory_space<vmem>>, %arg2: memref<32x128xbf16, #tpu.memory_space<vmem>>, %arg3: memref<1x128xf32, #tpu.memory_space<vmem>>, %arg4: memref<128x128xbf16, #tpu.memory_space<vmem>>, %arg5: memref<1x128xf32, #tpu.memory_space<vmem>>, %arg6: memref<8x128xbf16, #tpu.memory_space<vmem>>, %arg7: memref<8x1xf32, #tpu.memory_space<vmem>>, %arg8: memref<8x128xf32, #tpu.memory_space<vmem>>) attributes {dimension_semantics = [#tpu.dimension_semantics<parallel>], iteration_bounds = array<i64: 3>, scalar_prefetch = 0 : i64, scratch_operands = 0 : i64, tpu.core_type = #tpu.core_type<tc>, window_params = [{transform_indices = @transform_0, window_bounds = array<i64: 128, 32>}, {pipeline_mode = #tpu.pipeline_mode<synchronous>, transform_indices = @transform_1, window_bounds = array<i64: 32, 128>}, {pipeline_mode = #tpu.pipeline_mode<synchronous>, transform_indices = @transform_2, window_bounds = array<i64: 1, 128>}, {pipeline_mode = #tpu.pipeline_mode<synchronous>, transform_indices = @transform_3, window_bounds = array<i64: 128, 128>}, {pipeline_mode = #tpu.pipeline_mode<synchronous>, transform_indices = @transform_4, window_bounds = array<i64: 1, 128>}, {pipeline_mode = #tpu.pipeline_mode<synchronous>, transform_indices = @transform_5, window_bounds = array<i64: 8, 128>}, {pipeline_mode = #tpu.pipeline_mode<synchronous>, transform_indices = @transform_6, window_bounds = array<i64: 8, 1>}, {transform_indices = @transform_7, window_bounds = array<i64: 8, 128>}]} {
    %c0 = arith.constant 0 : index
    %c0_0 = arith.constant 0 : index
    %0 = vector.load %arg1[%c0, %c0_0] : memref<128x32xf32, #tpu.memory_space<vmem>>, vector<128x32xf32>
    %1 = arith.truncf %0 : vector<128x32xf32> to vector<128x32xbf16>
    %c0_1 = arith.constant 0 : index
    %c0_2 = arith.constant 0 : index
    %2 = vector.load %arg2[%c0_1, %c0_2] : memref<32x128xbf16, #tpu.memory_space<vmem>>, vector<32x128xbf16>
    %cst = arith.constant dense<0.000000e+00> : vector<128x128xf32>
    %3 = tpu.matmul %1, %2, %cst {dimension_numbers = #tpu.dot_dimension_numbers<[1], [0], [0], [1], [0, 0, 1, 1], [], []>} : vector<128x32xbf16>, vector<32x128xbf16>, vector<128x128xf32> -> vector<128x128xf32>
    %c0_3 = arith.constant 0 : index
    %c0_4 = arith.constant 0 : index
    %4 = vector.load %arg3[%c0_3, %c0_4] : memref<1x128xf32, #tpu.memory_space<vmem>>, vector<1x128xf32>
    %5 = vector.broadcast %4 : vector<1x128xf32> to vector<128x128xf32>
    %6 = arith.addf %3, %5 : vector<128x128xf32>
    %cst_5 = arith.constant 0.000000e+00 : f32
    %7 = vector.broadcast %cst_5 : f32 to vector<128x128xf32>
    %8 = arith.maximumf %6, %7 : vector<128x128xf32>
    %9 = arith.truncf %8 : vector<128x128xf32> to vector<128x128xbf16>
    %c0_6 = arith.constant 0 : index
    %c0_7 = arith.constant 0 : index
    %10 = vector.load %arg4[%c0_6, %c0_7] : memref<128x128xbf16, #tpu.memory_space<vmem>>, vector<128x128xbf16>
    %cst_8 = arith.constant dense<0.000000e+00> : vector<128x128xf32>
    %11 = tpu.matmul %9, %10, %cst_8 {dimension_numbers = #tpu.dot_dimension_numbers<[1], [0], [0], [1], [0, 0, 1, 1], [], []>} : vector<128x128xbf16>, vector<128x128xbf16>, vector<128x128xf32> -> vector<128x128xf32>
    %c0_9 = arith.constant 0 : index
    %c0_10 = arith.constant 0 : index
    %12 = vector.load %arg5[%c0_9, %c0_10] : memref<1x128xf32, #tpu.memory_space<vmem>>, vector<1x128xf32>
    %13 = vector.broadcast %12 : vector<1x128xf32> to vector<128x128xf32>
    %14 = arith.addf %11, %13 : vector<128x128xf32>
    %cst_11 = arith.constant 0.000000e+00 : f32
    %15 = vector.broadcast %cst_11 : f32 to vector<128x128xf32>
    %16 = arith.maximumf %14, %15 : vector<128x128xf32>
    %17 = arith.truncf %16 : vector<128x128xf32> to vector<128x128xbf16>
    %c0_12 = arith.constant 0 : index
    %c0_13 = arith.constant 0 : index
    %18 = vector.load %arg6[%c0_12, %c0_13] : memref<8x128xbf16, #tpu.memory_space<vmem>>, vector<8x128xbf16>
    %cst_14 = arith.constant dense<0.000000e+00> : vector<8x128xf32>
    %19 = tpu.matmul %18, %17, %cst_14 {dimension_numbers = #tpu.dot_dimension_numbers<[1], [1], [0], [0], [0, 0, 1, 0], [], []>} : vector<8x128xbf16>, vector<128x128xbf16>, vector<8x128xf32> -> vector<8x128xf32>
    %c0_15 = arith.constant 0 : index
    %c0_16 = arith.constant 0 : index
    %20 = vector.load %arg7[%c0_15, %c0_16] : memref<8x1xf32, #tpu.memory_space<vmem>>, vector<8x1xf32>
    %21 = vector.broadcast %20 : vector<8x1xf32> to vector<8x128xf32>
    %22 = arith.addf %19, %21 : vector<8x128xf32>
    %cst_17 = arith.constant 0.000000e+00 : f32
    %23 = vector.broadcast %cst_17 : f32 to vector<8x128xf32>
    %24 = arith.subf %23, %22 : vector<8x128xf32>
    %25 = math.exp %24 : vector<8x128xf32>
    %cst_18 = arith.constant 1.000000e+00 : f32
    %26 = vector.broadcast %cst_18 : f32 to vector<8x128xf32>
    %27 = arith.addf %26, %25 : vector<8x128xf32>
    %28 = tpu.reciprocal %27 {approx = true} : vector<8x128xf32> -> vector<8x128xf32>
    %c0_19 = arith.constant 0 : index
    %c0_20 = arith.constant 0 : index
    %29 = vector.load %arg8[%c0_19, %c0_20] : memref<8x128xf32, #tpu.memory_space<vmem>>, vector<8x128xf32>
    tpu.vector_store %arg8[%c0_19, %c0_20], %28 {strides = array<i32>} : memref<8x128xf32, #tpu.memory_space<vmem>>, vector<8x128xf32>,
    return
  }
  func.func @transform_0(%arg0: i32) -> (i32, i32) {
    %c0_i32 = arith.constant 0 : i32
    %c0_i32_0 = arith.constant 0 : i32
    return %arg0, %c0_i32 : i32, i32
  }
  func.func @transform_1(%arg0: i32) -> (i32, i32) {
    %c0_i32 = arith.constant 0 : i32
    %c0_i32_0 = arith.constant 0 : i32
    %c0_i32_1 = arith.constant 0 : i32
    return %c0_i32, %c0_i32_0 : i32, i32
  }
  func.func @transform_2(%arg0: i32) -> (i32, i32) {
    %c0_i32 = arith.constant 0 : i32
    %c0_i32_0 = arith.constant 0 : i32
    %c0_i32_1 = arith.constant 0 : i32
    return %c0_i32, %c0_i32_0 : i32, i32
  }
  func.func @transform_3(%arg0: i32) -> (i32, i32) {
    %c0_i32 = arith.constant 0 : i32
    %c0_i32_0 = arith.constant 0 : i32
    %c0_i32_1 = arith.constant 0 : i32
    return %c0_i32, %c0_i32_0 : i32, i32
  }
  func.func @transform_4(%arg0: i32) -> (i32, i32) {
    %c0_i32 = arith.constant 0 : i32
    %c0_i32_0 = arith.constant 0 : i32
    %c0_i32_1 = arith.constant 0 : i32
    return %c0_i32, %c0_i32_0 : i32, i32
  }
  func.func @transform_5(%arg0: i32) -> (i32, i32) {
    %c0_i32 = arith.constant 0 : i32
    %c0_i32_0 = arith.constant 0 : i32
    %c0_i32_1 = arith.constant 0 : i32
    return %c0_i32, %c0_i32_0 : i32, i32
  }
  func.func @transform_6(%arg0: i32) -> (i32, i32) {
    %c0_i32 = arith.constant 0 : i32
    %c0_i32_0 = arith.constant 0 : i32
    %c0_i32_1 = arith.constant 0 : i32
    return %c0_i32, %c0_i32_0 : i32, i32
  }
  func.func @transform_7(%arg0: i32) -> (i32, i32) {
    %c0_i32 = arith.constant 0 : i32
    %c0_i32_0 = arith.constant 0 : i32
    return %c0_i32, %arg0 : i32, i32
  }
}

</mosaic_0001>

<bundles_post_ra>
// kernel: _lambda_.1
= control target key start
LH: loop header
LB: loop body
LE: loop exit
PB: predicated region body
PF: predicated region fallthrough
CT: control target
= control target key end

     0   :  { %s985_s24 = smov 0   ;;  %s1084_s0 = inlined_call_operand.vmem [shape: f32[384,32], index: 0, kind: input, shape index: {}]   ;;  %s1085_s1 = inlined_call_operand.vmem [shape: bf16[32,128], index: 1, kind: input, shape index: {}]   ;;  %s1086_s2 = inlined_call_operand.vmem [shape: f32[1,128], index: 2, kind: input, shape index: {}, may-alias: {2,4}]   ;;  %s1087_s3 = inlined_call_operand.vmem [shape: bf16[128,128], index: 3, kind: input, shape index: {}]   ;;  %s1088_s4 = inlined_call_operand.vmem [shape: f32[1,128], index: 4, kind: input, shape index: {}, may-alias: {2,4}]   ;;  %s1089_s5 = inlined_call_operand.vmem [shape: bf16[8,128], index: 5, kind: input, shape index: {}]   ;;  %s1090_s6 = inlined_call_operand.vmem [shape: f32[8,1], index: 6, kind: input, shape index: {}]   ;;  %s1091_s7 = inlined_call_operand.vmem [shape: f32[8,384], index: 7, kind: output, shape index: {}]  }
   0x1 LB: > { %s991_s25 = sadd.s32 4294967295, %s940_s24   ;;  %p775_p0 = scmp.ge.s32.totalorder %s940_s24, 1  ;;  %s940_s24 = sphi %s985_s24, %s17_s24  }
   0x2   : > { %p238_p1 = scmp.lt.s32.totalorder %s940_s24, 4 }
   0x4   : > { %p239_p2 = pnand %p775_p0, %p238_p1 }
   0x5   : > { %s776_s28 = sshll.u32 (!%p239_p2), %s991_s25, 4  ;;  %p275_p4 = scmp.lt.s32.totalorder (!%p239_p2), %s991_s25, 2 }
   0x6   : > { %242 = sbr.rel (%p239_p2) target bundleno = 746 (0x2ea), region = 48  ;;  %p270_p3 = scmp.lt.s32.totalorder (!%p239_p2), %s776_s28, 47 }
   0xb   : > { %v920_v0 = vld [vmem:[%s1085_s1 + $0x8] sm:$0xff]   ;;  %v921_v1 = vld [vmem:[%s1085_s1] sm:$0xff]   ;;  %s1093_s28 = smov (!%p270_p3, %s776_s28), 47  ;;  %v922_v2 = vld [vmem:[%s1087_s3 + $0x38] sm:$0xff]   ;;  %vm327_vm0 = vcmask 261120   ;;  %vm943_vm1 = vmmov 0  }
   0xc   : > { %836 = vmatprep.subr.bf16.mxu1 %v920_v0  ;;  %s777_s10 = sshll.u32 %s1093_s28, 3  ;;  %v923_v12 = vld [vmem:[%s1087_s3 + $0x30] sm:$0xff]   ;;  %v924_v16 = vld [vmem:[%s1087_s3 + $0x28] sm:$0xff]   ;;  %v925_v20 = vld [vmem:[%s1087_s3 + $0x20] sm:$0xff]   ;;  %s1095_s25 = smov (!%p275_p4, %s991_s25), 2 }
   0xd   : > { %837 = vmatpush3.bf16.msra.mxu1 %v920_v0  ;;  %s1008_s13 = scalar_lea.vmem %s1084_s0, %s777_s10  ;;  %v926_v25 = vld [vmem:[%s1087_s3 + $0x18] sm:$0xff]   ;;  %v927_v31 = vld [vmem:[%s1087_s3 + $0x10] sm:$0xff]   ;;  %v928_v32 = vld [vmem:[%s1087_s3 + $0x8] sm:$0xff]   ;;  %s778_s15 = sshll.u32 %s1095_s25, 3 }
   0xe   : > { %838 = vmatprep.subr.bf16.mxu1 %v921_v1  ;;  %v280_v3 = vld [vmem:[%s1008_s13] sm:$0xff]  ;;  %v281_v4 = vld [vmem:[%s1008_s13 + $0x8] sm:$0xff]  ;;  %v282_v5 = vld [vmem:[%s1008_s13 + $0x10] sm:$0xff]  ;;  %s278_s18 = scalar_lea.vmem %s1091_s7, %s778_s15 }
   0xf   : > { %v296_v6 = vpack.c.bf16 %v281_v4, %v280_v3  ;;  %v283_v7 = vld [vmem:[%s1008_s13 + $0x18] sm:$0xff]  ;;  %v284_v8 = vld [vmem:[%s1008_s13 + $0x20] sm:$0xff]  ;;  %v285_v9 = vld [vmem:[%s1008_s13 + $0x28] sm:$0xff] }
  0x10   : > { %v297_v10 = vpack.c.bf16 %v283_v7, %v282_v5  ;;  %v298_v11 = vpack.c.bf16 %v285_v9, %v284_v8  ;;  %v286_v13 = vld [vmem:[%s1008_s13 + $0x30] sm:$0xff]  ;;  %v287_v14 = vld [vmem:[%s1008_s13 + $0x38] sm:$0xff]  ;;  %v288_v15 = vld [vmem:[%s1008_s13 + $0x40] sm:$0xff] }
  0x11   : > { %839 = vmatpush3.bf16.msra.mxu1 %v921_v1  ;;  %840 = vmatprep.mubr.msk.bf16.mxu1 %vm327_vm0, %v296_v6  ;;  %v289_v17 = vld [vmem:[%s1008_s13 + $0x48] sm:$0xff]  ;;  %v299_v18 = vpack.c.bf16 %v287_v14, %v286_v13  ;;  %v290_v21 = vld [vmem:[%s1008_s13 + $0x50] sm:$0xff]  ;;  %v291_v22 = vld [vmem:[%s1008_s13 + $0x58] sm:$0xff] }
  0x12   : > { %856 = vmatprep.subr.bf16.mxu1 %v922_v2  ;;  %v300_v19 = vpack.c.bf16 %v289_v17, %v288_v15  ;;  %v292_v23 = vld [vmem:[%s1008_s13 + $0x60] sm:$0xff]  ;;  %v293_v24 = vld [vmem:[%s1008_s13 + $0x68] sm:$0xff]  ;;  %v301_v26 = vpack.c.bf16 %v291_v22, %v290_v21  ;;  %v294_v28 = vld [vmem:[%s1008_s13 + $0x70] sm:$0xff] }
  0x13   : > { %v302_v27 = vpack.c.bf16 %v293_v24, %v292_v23  ;;  %v295_v29 = vld [vmem:[%s1008_s13 + $0x78] sm:$0xff]  ;;  %v929_v33 = vld [vmem:[%s1087_s3] sm:$0xff]  }
  0x14   : > { %841 = vmatmul.mubr.msk.bf16.vlgmr.msra.gmra.mxu1 %vm327_vm0, %v297_v10  ;;  %v303_v30 = vpack.c.bf16 %v295_v29, %v294_v28  ;;  %v779_v36 = vld [vmem:[%s1086_s2] ss:$0 sm:$0xff]  ;;  %v944_v29 = vmov 0  }
  0x15   : > { %844 = vmatprep.mubr.msk.bf16.mxu1 %vm327_vm0, %v298_v11  ;;  %857 = vmatpush3.bf16.msra.mxu1 %v922_v2  ;;  %v666_v28 = vld [vmem:[%s1090_s6] sm:$0xff] }
  0x16   : > { %858 = vmatprep.subr.bf16.mxu1 %v923_v12  ;;  %919 = vset.pattern.permute.xlu0 %v944_v29 }
  0x17   : > { %669 = vperm.xlu0 %919, %v666_v28  }
  0x19   : > { %859 = vmatpush3.bf16.msra.mxu1 %v923_v12 }
  0x1a   : > { %860 = vmatprep.subr.bf16.mxu1 %v924_v16 }
  0x1c   : > { %845 = vmatmul.mubr.msk.bf16.gmra.mxu1 %vm327_vm0, %v299_v18 }
  0x1d   : > { %848 = vmatprep.mubr.msk.bf16.mxu1 %vm327_vm0, %v300_v19  ;;  %861 = vmatpush3.bf16.msra.mxu1 %v924_v16 }
  0x1e   : > { %862 = vmatprep.subr.bf16.mxu1 %v925_v20 }
  0x21   : > { %863 = vmatpush3.bf16.msra.mxu1 %v925_v20 }
  0x22   : > { %864 = vmatprep.subr.bf16.mxu1 %v926_v25 }
  0x24   : > { %849 = vmatmul.mubr.msk.bf16.gmra.mxu1 %vm327_vm0, %v301_v26 }
  0x25   : > { %852 = vmatprep.mubr.msk.bf16.mxu1 %vm327_vm0, %v302_v27  ;;  %865 = vmatpush3.bf16.msra.mxu1 %v926_v25  ;;  %v942_v27 = vmov 0.0  }
  0x26   : > { %866 = vmatprep.subr.bf16.mxu1 %v927_v31  ;;  %888 = vmatprep.subr.bf16.mxu0 %v942_v27 }
  0x27   : > { %904 = vmatprep.mubr.msk.bf16.mxu0 %vm943_vm1, %v942_v27 }
  0x29   : > { %867 = vmatpush3.bf16.msra.mxu1 %v927_v31  ;;  %v790_v31 = vld [vmem:[%s1088_s4] ss:$0 sm:$0xff] }
  0x2a   : > { %868 = vmatprep.subr.bf16.mxu1 %v928_v32 }
  0x2c   : > { %853 = vmatmul.mubr.msk.bf16.gmra.mxu1 %vm327_vm0, %v303_v30 }
  0x2d   : > { %869 = vmatpush3.bf16.msra.mxu1 %v928_v32 }
  0x2e   : > { %870 = vmatprep.subr.bf16.mxu1 %v929_v33 }
  0x31   : > { %871 = vmatpush3.bf16.msra.mxu1 %v929_v33 }
  0xd4   : > { %v842_v34 = vpop.f32.mrf.mxu1 }
  0xd5   : > { %v395_v40 = vadd.f32 %v842_v34, %v779_v36 }
  0xd6   : > { %v386_v35 = vpop.f32.mrf.mxu1 }
  0xd7   : > { %v387_v38 = vadd.f32 %v779_v36, %v386_v35  ;;  %v451_v47 = vmax.f32 %v395_v40, 0.0 }
  0xd8   : > { %v843_v37 = vpop.f32.mrf.mxu1 }
  0xd9   : > { %v398_v39 = vadd.f32 %v843_v37, %v779_v36  ;;  %v449_v45 = vmax.f32 %v387_v38, 0.0 }
  0xda   : > { %v389_v41 = vpop.f32.mrf.mxu1 }
  0xdb   : > { %v390_v42 = vadd.f32 %v779_v36, %v389_v41  ;;  %v452_v43 = vmax.f32 %v398_v39, 0.0 }
  0xdc   : > { %v846_v44 = vpop.f32.mrf.mxu1 }
  0xdd   : > { %v450_v46 = vmax.f32 %v390_v42, 0.0  ;;  %v466_v50 = vpack.c.bf16 %v452_v43, %v451_v47  ;;  %v411_v54 = vadd.f32 %v846_v44, %v779_v36 }
  0xde   : > { %v402_v48 = vpop.f32.mrf.mxu1 }
  0xdf   : > { %v465_v49 = vpack.c.bf16 %v450_v46, %v449_v45  ;;  %v403_v52 = vadd.f32 %v779_v36, %v402_v48  ;;  %v455_v61 = vmax.f32 %v411_v54, 0.0 }
  0xe0   : > { %v847_v51 = vpop.f32.mrf.mxu1 }
  0xe1   : > { %v414_v53 = vadd.f32 %v847_v51, %v779_v36  ;;  %872 = vmatprep.mubr.bf16.mxu1 %v465_v49  ;;  %v453_v59 = vmax.f32 %v403_v52, 0.0 }
  0xe2   : > { %v405_v55 = vpop.f32.mrf.mxu1  ;;  %873 = vmatmul.mubr.bf16.vlgmr.msra.gmra.mxu1 %v466_v50 }
  0xe3   : > { %v406_v56 = vadd.f32 %v779_v36, %v405_v55  ;;  %v456_v57 = vmax.f32 %v414_v53, 0.0 }
  0xe4   : > { %v850_v58 = vpop.f32.mrf.mxu1 }
  0xe5   : > { %v454_v60 = vmax.f32 %v406_v56, 0.0  ;;  %v468_v0 = vpack.c.bf16 %v456_v57, %v455_v61  ;;  %v427_v4 = vadd.f32 %v850_v58, %v779_v36 }
  0xe6   : > { %v418_v62 = vpop.f32.mrf.mxu1 }
  0xe7   : > { %v467_v63 = vpack.c.bf16 %v454_v60, %v453_v59  ;;  %v419_v2 = vadd.f32 %v779_v36, %v418_v62  ;;  %v459_v11 = vmax.f32 %v427_v4, 0.0 }
  0xe8   : > { %v851_v1 = vpop.f32.mrf.mxu1 }
  0xe9   : > { %v430_v3 = vadd.f32 %v851_v1, %v779_v36  ;;  %876 = vmatprep.mubr.bf16.mxu1 %v467_v63  ;;  %v457_v9 = vmax.f32 %v419_v2, 0.0 }
  0xea   : > { %v421_v5 = vpop.f32.mrf.mxu1  ;;  %877 = vmatmul.mubr.bf16.gmra.mxu1 %v468_v0 }
  0xeb   : > { %v422_v6 = vadd.f32 %v779_v36, %v421_v5  ;;  %v460_v7 = vmax.f32 %v430_v3, 0.0 }
  0xec   : > { %v854_v8 = vpop.f32.mrf.mxu1 }
  0xed   : > { %v458_v10 = vmax.f32 %v422_v6, 0.0  ;;  %v470_v14 = vpack.c.bf16 %v460_v7, %v459_v11  ;;  %v443_v18 = vadd.f32 %v854_v8, %v779_v36 }
  0xee   : > { %v434_v12 = vpop.f32.mrf.mxu1 }
  0xef   : > { %v469_v13 = vpack.c.bf16 %v458_v10, %v457_v9  ;;  %v435_v16 = vadd.f32 %v779_v36, %v434_v12  ;;  %v463_v24 = vmax.f32 %v443_v18, 0.0 }
  0xf0   : > { %v855_v15 = vpop.f32.mrf.mxu1 }
  0xf1   : > { %v446_v17 = vadd.f32 %v855_v15, %v779_v36  ;;  %880 = vmatprep.mubr.bf16.mxu1 %v469_v13  ;;  %v461_v22 = vmax.f32 %v435_v16, 0.0 }
  0xf2   : > { %v437_v19 = vpop.f32.mrf.mxu1  ;;  %881 = vmatmul.mubr.bf16.gmra.mxu1 %v470_v14 }
  0xf3   : > { %v438_v20 = vadd.f32 %v779_v36, %v437_v19  ;;  %v464_v21 = vmax.f32 %v446_v17, 0.0 }
  0xf5   : > { %v462_v23 = vmax.f32 %v438_v20, 0.0  ;;  %v472_v26 = vpack.c.bf16 %v464_v21, %v463_v24  ;;  %v670_v24 = vpop.permute.xlu0 %669 }
  0xf7   : > { %v471_v25 = vpack.c.bf16 %v462_v23, %v461_v22  ;;  %v665_v23 = vld [vmem:[%s1089_s5] sm:$0xf] }
  0xf9   : > { %884 = vmatprep.mubr.bf16.mxu1 %v471_v25 }
  0xfa   : > { %885 = vmatmul.mubr.bf16.gmra.mxu1 %v472_v26 }
 0x1a2   : > { %v874_v30 = vpop.f32.mrf.mxu1 }
 0x1a3   : > { %v587_v33 = vadd.f32 %v874_v30, %v790_v31 }
 0x1a4   : > { %v578_v32 = vpop.f32.mrf.mxu1 }
 0x1a5   : > { %v579_v35 = vadd.f32 %v790_v31, %v578_v32  ;;  %v643_v38 = vmax.f32 %v587_v33, 0.0 }
 0x1a6   : > { %v875_v34 = vpop.f32.mrf.mxu1 }
 0x1a7   : > { %v590_v36 = vadd.f32 %v875_v34, %v790_v31  ;;  %v641_v42 = vmax.f32 %v579_v35, 0.0 }
 0x1a8   : > { %v581_v37 = vpop.f32.mrf.mxu1 }
 0x1a9   : > { %v644_v39 = vmax.f32 %v590_v36, 0.0  ;;  %v582_v40 = vadd.f32 %v790_v31, %v581_v37 }
 0x1aa   : > { %v878_v41 = vpop.f32.mrf.mxu1 }
 0x1ab   : > { %v658_v43 = vpack.c.bf16 %v644_v39, %v643_v38  ;;  %v642_v44 = vmax.f32 %v582_v40, 0.0  ;;  %v603_v14 = vadd.f32 %v878_v41, %v790_v31 }
 0x1ac   : > { %v594_v45 = vpop.f32.mrf.mxu1 }
 0x1ad   : > { %v657_v46 = vpack.c.bf16 %v642_v44, %v641_v42  ;;  %v647_v16 = vmax.f32 %v603_v14, 0.0  ;;  %v595_v19 = vadd.f32 %v790_v31, %v594_v45 }
 0x1ae   : > { %v879_v47 = vpop.f32.mrf.mxu1 }
 0x1af   : > { %v606_v12 = vadd.f32 %v879_v47, %v790_v31  ;;  %v645_v21 = vmax.f32 %v595_v19, 0.0 }
 0x1b0   : > { %v597_v48 = vpop.f32.mrf.mxu1 }
 0x1b1   : > { %v648_v15 = vmax.f32 %v606_v12, 0.0  ;;  %v598_v18 = vadd.f32 %v790_v31, %v597_v48 }
 0x1b2   : > { %v882_v49 = vpop.f32.mrf.mxu1 }
 0x1b3   : > { %v619_v4 = vadd.f32 %v882_v49, %v790_v31  ;;  %v660_v17 = vpack.c.bf16 %v648_v15, %v647_v16  ;;  %v646_v20 = vmax.f32 %v598_v18, 0.0 }
 0x1b4   : > { %v610_v50 = vpop.f32.mrf.mxu1 }
 0x1b5   : > { %v651_v6 = vmax.f32 %v619_v4, 0.0  ;;  %v611_v9 = vadd.f32 %v790_v31, %v610_v50  ;;  %v659_v22 = vpack.c.bf16 %v646_v20, %v645_v21 }
 0x1b6   : > { %v883_v51 = vpop.f32.mrf.mxu1 }
 0x1b7   : > { %v622_v2 = vadd.f32 %v883_v51, %v790_v31  ;;  %v649_v11 = vmax.f32 %v611_v9, 0.0 }
 0x1b8   : > { %v613_v52 = vpop.f32.mrf.mxu1 }
 0x1b9   : > { %v652_v5 = vmax.f32 %v622_v2, 0.0  ;;  %v614_v8 = vadd.f32 %v790_v31, %v613_v52 }
 0x1ba   : > { %v886_v53 = vpop.f32.mrf.mxu1 }
 0x1bb   : > { %v635_v55 = vadd.f32 %v886_v53, %v790_v31  ;;  %v662_v7 = vpack.c.bf16 %v652_v5, %v651_v6  ;;  %v650_v10 = vmax.f32 %v614_v8, 0.0 }
 0x1bc   : > { %v626_v54 = vpop.f32.mrf.mxu1 }
 0x1bd   : > { %v655_v59 = vmax.f32 %v635_v55, 0.0  ;;  %v627_v63 = vadd.f32 %v790_v31, %v626_v54  ;;  %v661_v13 = vpack.c.bf16 %v650_v10, %v649_v11 }
 0x1be   : > { %v887_v56 = vpop.f32.mrf.mxu1 }
 0x1bf   : > { %v638_v57 = vadd.f32 %v887_v56, %v790_v31  ;;  %v653_v1 = vmax.f32 %v627_v63, 0.0 }
 0x1c0   : > { %v629_v58 = vpop.f32.mrf.mxu1 }
 0x1c1   : > { %v656_v60 = vmax.f32 %v638_v57, 0.0  ;;  %v630_v61 = vadd.f32 %v790_v31, %v629_v58 }
 0x1c3   : > { %v664_v62 = vpack.c.bf16 %v656_v60, %v655_v59  ;;  %v654_v0 = vmax.f32 %v630_v61, 0.0 }
 0x1c5   : > { %889 = vmatpush3.bf16.xpose.msra.mxu0 %v664_v62  ;;  %v663_v3 = vpack.c.bf16 %v654_v0, %v653_v1 }
 0x1c6   : > { %890 = vmatprep.subr.bf16.mxu0 %v942_v27 }
 0x1cd   : > { %891 = vmatpush3.bf16.xpose.msra.mxu0 %v663_v3 }
 0x1ce   : > { %892 = vmatprep.subr.bf16.mxu0 %v942_v27 }
 0x1d5   : > { %893 = vmatpush3.bf16.xpose.msra.mxu0 %v662_v7 }
 0x1d6   : > { %894 = vmatprep.subr.bf16.mxu0 %v942_v27 }
 0x1dd   : > { %895 = vmatpush3.bf16.xpose.msra.mxu0 %v661_v13 }
 0x1de   : > { %896 = vmatprep.subr.bf16.mxu0 %v942_v27 }
 0x1e5   : > { %897 = vmatpush3.bf16.xpose.msra.mxu0 %v660_v17 }
 0x1e6   : > { %898 = vmatprep.subr.bf16.mxu0 %v942_v27 }
 0x1ed   : > { %899 = vmatpush3.bf16.xpose.msra.mxu0 %v659_v22 }
 0x1ee   : > { %900 = vmatprep.subr.bf16.mxu0 %v942_v27 }
 0x1f5   : > { %901 = vmatpush3.bf16.xpose.msra.mxu0 %v658_v43 }
 0x1f6   : > { %902 = vmatprep.subr.bf16.mxu0 %v942_v27 }
 0x1fd   : > { %903 = vmatpush3.bf16.xpose.msra.mxu0 %v657_v46 }
 0x204   : > { %905 = vmatmul.mubr.bf16.vlgmr.msra.gmra.mxu0 %v665_v23 }
 0x2c4   : > { %v706_v25 = vpop.f32.mrf.mxu0 }
 0x2c5   : > { %v707_v26 = vadd.f32 %v706_v25, %v670_v24 }
 0x2c6   : > { %v906_v28 = vpop.f32.mrf.mxu0 }
 0x2c7   : > { %v712_v29 = vsub.f32 0.0, %v707_v26 }
 0x2c8   : > { %v709_v30 = vpop.f32.mrf.mxu0 }
 0x2c9   : > { %v713_v31 = vmul.f32 1.442695, %v712_v29 }
 0x2ca   : > { %v907_v32 = vpop.f32.mrf.mxu0 }
 0x2cb   : > { %930 = vpow2.f32 %v713_v31 }
 0x2d8   : > { %v931_v33 = vpop.eup %930 }
 0x2d9   : > { %v715_v34 = vadd.f32 1.0, %v931_v33 }
 0x2db   : > { %932 = vrcp.f32 %v715_v34 }
 0x2e8   : > { %v933_v27 = vpop.eup %932 }
 0x2e9   : > { %717 = vst [vmem:[%s278_s18] sm:$0xff] %v933_v27 }
 0x2ea PF: > { %s17_s24 = sadd.s32 1, %s940_s24  }
 0x2eb   : > { %p14_p5 = scmp.ge.s32.totalorder %s17_s24, 5  }
 0x2ed   :  { %16 = sbr.rel (!%p14_p5) target bundleno = 1 (0x1), region = 78 }

</bundles_post_ra>
